<compile_context>
chip_gen: v7x
topology: tpu7x:2x2x1
jax: 0.10.0
libtpu: 0.0.40
codegen_flags: <defaults>
</compile_context>

<pallas_src>
import jax
import jax.numpy as jnp
from jax import lax
from jax.experimental import pallas as pl
from jax.experimental.pallas import tpu as pltpu

EPS = 1e-5      # PyTorch InstanceNorm2d default eps (affine=False, no running stats)
BAND = 16       # sublane rows per tap in the im2col slab (bf16 packed-tile height)
GUARD = 128     # lane guard: keeps every tap slice in-bounds, keeps big stores aligned


def _round_up(x, m):
    return (x + m - 1) // m * m


def _make_kernel(H, W, C):
    Hp, Wp = H + 2, W + 2
    L = Hp * Wp                      # flattened padded-frame length
    Lc = _round_up(L, 128)           # lane-dense compute width
    Lbuf = GUARD + Lc + GUARD        # guarded activation buffer width
    K = 9 * BAND                     # fused contraction depth (zero-padded bands)
    inv_hw = 1.0 / (H * W)
    # flat tap offsets, k = (dh+1)*3 + (dw+1)
    offs = tuple(dh * Wp + dw for dh in (-1, 0, 1) for dw in (-1, 0, 1))

    def kernel(mask_ref, x_ref, w1_ref, w2_ref, o_ref, src_buf, taps_buf):
        # mask_ref: (1, Lc) f32   x_ref: (C, Lc) f32   w*_ref: (C, K) bf16
        # o_ref:    (C, Lc)       src_buf: (C, Lbuf) bf16   taps_buf: (K, Lc) bf16
        mask = mask_ref[...]                      # 1.0 on the H*W interior pixels

        # Zero the lane guards and the im2col slab once per step (filler rows hit zero
        # weights, but uninitialized VMEM could hold NaNs).  All stores lane-aligned.
        src_buf[:, pl.ds(0, GUARD)] = jnp.zeros((C, GUARD), jnp.bfloat16)
        src_buf[:, pl.ds(GUARD + Lc, GUARD)] = jnp.zeros((C, GUARD), jnp.bfloat16)
        taps_buf[...] = jnp.zeros((K, Lc), jnp.bfloat16)

        def conv3x3(act, w_ref):
            # act: (C, Lc) f32 with exact zeros on the halo ring (= conv zero padding).
            # One f32->bf16 cast, one aligned store, 9 lane-shifted tap loads into
            # tile-aligned 16-row bands, then a single fused K=9*BAND MXU matmul.
            src_buf[:, pl.ds(GUARD, Lc)] = act.astype(jnp.bfloat16)
            for k, off in enumerate(offs):
                taps_buf[pl.ds(k * BAND, C), :] = src_buf[:, pl.ds(GUARD + off, Lc)]
            return jnp.dot(w_ref[...], taps_buf[...],
                           preferred_element_type=jnp.float32)        # (C, Lc) f32

        def instance_norm(z):
            # Per-channel mean / biased variance over the H*W interior pixels only;
            # output is exactly 0 at halo / tail positions (next conv's zero padding).
            m = jnp.sum(z * mask, axis=1, keepdims=True) * inv_hw
            dm = (z - m) * mask
            v = jnp.sum(dm * dm, axis=1, keepdims=True) * inv_hw
            return dm * lax.rsqrt(v + EPS)

        x = x_ref[...]                                                  # f32 residual
        h1 = jnp.maximum(instance_norm(conv3x3(x, w1_ref)), 0.0)
        z2 = instance_norm(conv3x3(h1, w2_ref))
        o_ref[...] = jnp.maximum(z2 + x, 0.0).astype(o_ref.dtype)

    return kernel, L, Lc, Lbuf, K


def _flatten_weight(w_oihw, band):
    # OIHW -> (O, 9*band), tap-major / channel-minor with zero filler rows, matching
    # the im2col slab (tap k occupies slab rows [k*band, k*band + I)).
    O, I = w_oihw.shape[0], w_oihw.shape[1]
    w = jnp.transpose(w_oihw, (0, 2, 3, 1)).reshape(O, 9, I)
    w = jnp.pad(w, ((0, 0), (0, 0), (0, band - I)))
    return w.reshape(O, 9 * band).astype(jnp.bfloat16)


@jax.jit
def basic_block(x_nchw, w1_oihw, w2_oihw):
    N, Cin, H, W = x_nchw.shape
    Cout = w1_oihw.shape[0]
    assert Cin == Cout, "identity shortcut requires in_planes == planes (stride=1)"

    kernel, L, Lc, Lbuf, K = _make_kernel(H, W, Cout)
    Hp, Wp = H + 2, W + 2

    # activations: NCHW -> zero halo ring -> flatten spatial onto lanes -> pad to Lc
    xp = jnp.pad(x_nchw, ((0, 0), (0, 0), (1, 1), (1, 1)))
    x = jnp.pad(xp.reshape(N, Cin, L), ((0, 0), (0, 0), (0, Lc - L)))    # (N, C, Lc) f32

    # interior-pixel mask (batch invariant), hoisted out of the kernel
    row_ok = (jnp.arange(Hp) >= 1) & (jnp.arange(Hp) <= H)
    col_ok = (jnp.arange(Wp) >= 1) & (jnp.arange(Wp) <= W)
    mask = (row_ok[:, None] & col_ok[None, :]).astype(jnp.float32).reshape(1, L)
    mask = jnp.pad(mask, ((0, 0), (0, Lc - L)))                           # (1, Lc)

    w1 = _flatten_weight(w1_oihw, BAND)        # (Cout, K) bf16
    w2 = _flatten_weight(w2_oihw, BAND)

    out_pad = pl.pallas_call(
        kernel,
        out_shape=jax.ShapeDtypeStruct((N, Cout, Lc), x_nchw.dtype),
        grid_spec=pltpu.PrefetchScalarGridSpec(
            num_scalar_prefetch=0,
            grid=(N,),
            in_specs=[
                pl.BlockSpec((1, Lc), lambda n: (0, 0)),             # mask (resident)
                pl.BlockSpec((None, Cin, Lc), lambda n: (n, 0, 0)),  # x
                pl.BlockSpec((Cout, K), lambda n: (0, 0)),           # w1 (resident)
                pl.BlockSpec((Cout, K), lambda n: (0, 0)),           # w2 (resident)
            ],
            out_specs=pl.BlockSpec((None, Cout, Lc), lambda n: (n, 0, 0)),
            scratch_shapes=[
                pltpu.VMEM((Cout, Lbuf), jnp.bfloat16),   # guarded bf16 activation buffer
                pltpu.VMEM((K, Lc), jnp.bfloat16),        # fused im2col slab
            ],
        ),
        compiler_params=pltpu.CompilerParams(
            # N>=2 keeps both v7x TensorCores busy; on v5e/v6e the grid is a serial loop.
            # TODO(synk): batch several images per grid step for v5e/v6e and add a
            # spatial row-block grid axis before scaling C/H/W (v7x 64 MiB VMEM budget).
            dimension_semantics=("parallel",),
            vmem_limit_bytes=32 * 1024 * 1024,
        ),
    )(mask, x, w1, w2)

    # drop the tail + halo frame; layout is already NCHW
    return out_pad[:, :, :L].reshape(N, Cout, Hp, Wp)[:, :, 1:H + 1, 1:W + 1]


def reference(x, w1, w2):
    """Pure-JAX f32 reference matching the PyTorch forward (NCHW)."""
    def conv(z, w):
        return lax.conv_general_dilated(
            z, w, window_strides=(1, 1), padding=((1, 1), (1, 1)),
            dimension_numbers=("NCHW", "OIHW", "NCHW"))

    def inorm(z):
        m = z.mean(axis=(2, 3), keepdims=True)
        v = ((z - m) ** 2).mean(axis=(2, 3), keepdims=True)
        return (z - m) / jnp.sqrt(v + EPS)

    out = jax.nn.relu(inorm(conv(x, w1)))
    out = inorm(conv(out, w2))
    return jax.nn.relu(out + x)            # identity shortcut


if __name__ == "__main__":
    key = jax.random.PRNGKey(0)
    kx, k1, k2 = jax.random.split(key, 3)

    N, C, H, W = 2, 4, 16, 16
    x = jax.random.normal(kx, (N, C, H, W), dtype=jnp.float32)
    # deterministic synthetic weights (BasicBlock(4, 4, stride=1): convs are bias-free)
    conv1_w = 0.1 * jax.random.normal(k1, (C, C, 3, 3), dtype=jnp.float32)   # OIHW
    conv2_w = 0.1 * jax.random.normal(k2, (C, C, 3, 3), dtype=jnp.float32)   # OIHW

    out = jax.block_until_ready(basic_block(x, conv1_w, conv2_w))

    ref = reference(x, conv1_w, conv2_w)
    assert out.shape == ref.shape == (N, C, H, W)
    # bf16 MXU operands -> same accuracy envelope as the previously-passing version.
    max_err = float(jnp.max(jnp.abs(out - ref)))
    assert jnp.allclose(out, ref, atol=5e-2, rtol=5e-2), max_err

    print("KERNEL_OK")
</pallas_src>

<mosaic_0001>
module attributes {stable_mosaic.version = 11 : i64} {
  func.func @kernel(%arg0: i32, %arg1: memref<1x384xf32, #tpu.memory_space<vmem>>, %arg2: memref<1x4x384xf32, #tpu.memory_space<vmem>>, %arg3: memref<4x144xbf16, #tpu.memory_space<vmem>>, %arg4: memref<4x144xbf16, #tpu.memory_space<vmem>>, %arg5: memref<1x4x384xf32, #tpu.memory_space<vmem>>, %arg6: memref<4x640xbf16, #tpu.memory_space<vmem>>, %arg7: memref<144x384xbf16, #tpu.memory_space<vmem>>) attributes {dimension_semantics = [#tpu.dimension_semantics<parallel>], iteration_bounds = array<i64: 2>, scalar_prefetch = 0 : i64, scratch_operands = 2 : i64, tpu.core_type = #tpu.core_type<tc>, window_params = [{pipeline_mode = #tpu.pipeline_mode<synchronous>, transform_indices = @transform_0, window_bounds = array<i64: 1, 384>}, {transform_indices = @transform_1, window_bounds = array<i64: 1, 4, 384>}, {pipeline_mode = #tpu.pipeline_mode<synchronous>, transform_indices = @transform_2, window_bounds = array<i64: 4, 144>}, {pipeline_mode = #tpu.pipeline_mode<synchronous>, transform_indices = @transform_3, window_bounds = array<i64: 4, 144>}, {transform_indices = @transform_4, window_bounds = array<i64: 1, 4, 384>}]} {
    %c0 = arith.constant 0 : index
    %c0_0 = arith.constant 0 : index
    %0 = vector.load %arg1[%c0, %c0_0] : memref<1x384xf32, #tpu.memory_space<vmem>>, vector<1x384xf32>
    %cst = arith.constant 0.000000e+00 : bf16
    %1 = vector.broadcast %cst : bf16 to vector<4x128xbf16>
    %c0_1 = arith.constant 0 : index
    %c0_2 = arith.constant 0 : index
    %2 = vector.load %arg6[%c0_1, %c0_2] : memref<4x640xbf16, #tpu.memory_space<vmem>>, vector<4x128xbf16>
    tpu.vector_store %arg6[%c0_1, %c0_2], %1 {strides = array<i32>} : memref<4x640xbf16, #tpu.memory_space<vmem>>, vector<4x128xbf16>,
    %cst_3 = arith.constant 0.000000e+00 : bf16
    %3 = vector.broadcast %cst_3 : bf16 to vector<4x128xbf16>
    %c0_4 = arith.constant 0 : index
    %c512 = arith.constant 512 : index
    %4 = vector.load %arg6[%c0_4, %c512] : memref<4x640xbf16, #tpu.memory_space<vmem>>, vector<4x128xbf16>
    tpu.vector_store %arg6[%c0_4, %c512], %3 {strides = array<i32>} : memref<4x640xbf16, #tpu.memory_space<vmem>>, vector<4x128xbf16>,
    %cst_5 = arith.constant 0.000000e+00 : bf16
    %5 = vector.broadcast %cst_5 : bf16 to vector<144x384xbf16>
    %c0_6 = arith.constant 0 : index
    %c0_7 = arith.constant 0 : index
    %6 = vector.load %arg7[%c0_6, %c0_7] : memref<144x384xbf16, #tpu.memory_space<vmem>>, vector<144x384xbf16>
    tpu.vector_store %arg7[%c0_6, %c0_7], %5 {strides = array<i32>} : memref<144x384xbf16, #tpu.memory_space<vmem>>, vector<144x384xbf16>,
    %c0_8 = arith.constant 0 : index
    %c0_9 = arith.constant 0 : index
    %c0_10 = arith.constant 0 : index
    %7 = vector.load %arg2[%c0_8, %c0_9, %c0_10] : memref<1x4x384xf32, #tpu.memory_space<vmem>>, vector<1x4x384xf32>
    %8 = vector.shape_cast %7 : vector<1x4x384xf32> to vector<4x384xf32>
    %9 = arith.truncf %8 : vector<4x384xf32> to vector<4x384xbf16>
    %c0_11 = arith.constant 0 : index
    %c128 = arith.constant 128 : index
    %10 = vector.load %arg6[%c0_11, %c128] : memref<4x640xbf16, #tpu.memory_space<vmem>>, vector<4x384xbf16>
    tpu.vector_store %arg6[%c0_11, %c128], %9 {strides = array<i32>} : memref<4x640xbf16, #tpu.memory_space<vmem>>, vector<4x384xbf16>,
    %c0_12 = arith.constant 0 : index
    %c109 = arith.constant 109 : index
    %11 = vector.load %arg6[%c0_12, %c109] : memref<4x640xbf16, #tpu.memory_space<vmem>>, vector<4x384xbf16>
    %c0_13 = arith.constant 0 : index
    %c0_14 = arith.constant 0 : index
    %12 = vector.load %arg7[%c0_13, %c0_14] : memref<144x384xbf16, #tpu.memory_space<vmem>>, vector<4x384xbf16>
    tpu.vector_store %arg7[%c0_13, %c0_14], %11 {strides = array<i32>} : memref<144x384xbf16, #tpu.memory_space<vmem>>, vector<4x384xbf16>,
    %c0_15 = arith.constant 0 : index
    %c110 = arith.constant 110 : index
    %13 = vector.load %arg6[%c0_15, %c110] : memref<4x640xbf16, #tpu.memory_space<vmem>>, vector<4x384xbf16>
    %c16 = arith.constant 16 : index
    %c0_16 = arith.constant 0 : index
    %14 = vector.load %arg7[%c16, %c0_16] : memref<144x384xbf16, #tpu.memory_space<vmem>>, vector<4x384xbf16>
    tpu.vector_store %arg7[%c16, %c0_16], %13 {strides = array<i32>} : memref<144x384xbf16, #tpu.memory_space<vmem>>, vector<4x384xbf16>,
    %c0_17 = arith.constant 0 : index
    %c111 = arith.constant 111 : index
    %15 = vector.load %arg6[%c0_17, %c111] : memref<4x640xbf16, #tpu.memory_space<vmem>>, vector<4x384xbf16>
    %c32 = arith.constant 32 : index
    %c0_18 = arith.constant 0 : index
    %16 = vector.load %arg7[%c32, %c0_18] : memref<144x384xbf16, #tpu.memory_space<vmem>>, vector<4x384xbf16>
    tpu.vector_store %arg7[%c32, %c0_18], %15 {strides = array<i32>} : memref<144x384xbf16, #tpu.memory_space<vmem>>, vector<4x384xbf16>,
    %c0_19 = arith.constant 0 : index
    %c127 = arith.constant 127 : index
    %17 = vector.load %arg6[%c0_19, %c127] : memref<4x640xbf16, #tpu.memory_space<vmem>>, vector<4x384xbf16>
    %c48 = arith.constant 48 : index
    %c0_20 = arith.constant 0 : index
    %18 = vector.load %arg7[%c48, %c0_20] : memref<144x384xbf16, #tpu.memory_space<vmem>>, vector<4x384xbf16>
    tpu.vector_store %arg7[%c48, %c0_20], %17 {strides = array<i32>} : memref<144x384xbf16, #tpu.memory_space<vmem>>, vector<4x384xbf16>,
    %c0_21 = arith.constant 0 : index
    %c128_22 = arith.constant 128 : index
    %19 = vector.load %arg6[%c0_21, %c128_22] : memref<4x640xbf16, #tpu.memory_space<vmem>>, vector<4x384xbf16>
    %c64 = arith.constant 64 : index
    %c0_23 = arith.constant 0 : index
    %20 = vector.load %arg7[%c64, %c0_23] : memref<144x384xbf16, #tpu.memory_space<vmem>>, vector<4x384xbf16>
    tpu.vector_store %arg7[%c64, %c0_23], %19 {strides = array<i32>} : memref<144x384xbf16, #tpu.memory_space<vmem>>, vector<4x384xbf16>,
    %c0_24 = arith.constant 0 : index
    %c129 = arith.constant 129 : index
    %21 = vector.load %arg6[%c0_24, %c129] : memref<4x640xbf16, #tpu.memory_space<vmem>>, vector<4x384xbf16>
    %c80 = arith.constant 80 : index
    %c0_25 = arith.constant 0 : index
    %22 = vector.load %arg7[%c80, %c0_25] : memref<144x384xbf16, #tpu.memory_space<vmem>>, vector<4x384xbf16>
    tpu.vector_store %arg7[%c80, %c0_25], %21 {strides = array<i32>} : memref<144x384xbf16, #tpu.memory_space<vmem>>, vector<4x384xbf16>,
    %c0_26 = arith.constant 0 : index
    %c145 = arith.constant 145 : index
    %23 = vector.load %arg6[%c0_26, %c145] : memref<4x640xbf16, #tpu.memory_space<vmem>>, vector<4x384xbf16>
    %c96 = arith.constant 96 : index
    %c0_27 = arith.constant 0 : index
    %24 = vector.load %arg7[%c96, %c0_27] : memref<144x384xbf16, #tpu.memory_space<vmem>>, vector<4x384xbf16>
    tpu.vector_store %arg7[%c96, %c0_27], %23 {strides = array<i32>} : memref<144x384xbf16, #tpu.memory_space<vmem>>, vector<4x384xbf16>,
    %c0_28 = arith.constant 0 : index
    %c146 = arith.constant 146 : index
    %25 = vector.load %arg6[%c0_28, %c146] : memref<4x640xbf16, #tpu.memory_space<vmem>>, vector<4x384xbf16>
    %c112 = arith.constant 112 : index
    %c0_29 = arith.constant 0 : index
    %26 = vector.load %arg7[%c112, %c0_29] : memref<144x384xbf16, #tpu.memory_space<vmem>>, vector<4x384xbf16>
    tpu.vector_store %arg7[%c112, %c0_29], %25 {strides = array<i32>} : memref<144x384xbf16, #tpu.memory_space<vmem>>, vector<4x384xbf16>,
    %c0_30 = arith.constant 0 : index
    %c147 = arith.constant 147 : index
    %27 = vector.load %arg6[%c0_30, %c147] : memref<4x640xbf16, #tpu.memory_space<vmem>>, vector<4x384xbf16>
    %c128_31 = arith.constant 128 : index
    %c0_32 = arith.constant 0 : index
    %28 = vector.load %arg7[%c128_31, %c0_32] : memref<144x384xbf16, #tpu.memory_space<vmem>>, vector<4x384xbf16>
    tpu.vector_store %arg7[%c128_31, %c0_32], %27 {strides = array<i32>} : memref<144x384xbf16, #tpu.memory_space<vmem>>, vector<4x384xbf16>,
    %c0_33 = arith.constant 0 : index
    %c0_34 = arith.constant 0 : index
    %29 = vector.load %arg3[%c0_33, %c0_34] : memref<4x144xbf16, #tpu.memory_space<vmem>>, vector<4x144xbf16>
    %c0_35 = arith.constant 0 : index
    %c0_36 = arith.constant 0 : index
    %30 = vector.load %arg7[%c0_35, %c0_36] : memref<144x384xbf16, #tpu.memory_space<vmem>>, vector<144x384xbf16>
    %cst_37 = arith.constant dense<0.000000e+00> : vector<4x384xf32>
    %31 = tpu.matmul %29, %30, %cst_37 {dimension_numbers = #tpu.dot_dimension_numbers<[1], [0], [0], [1], [0, 0, 1, 1], [], []>} : vector<4x144xbf16>, vector<144x384xbf16>, vector<4x384xf32> -> vector<4x384xf32>
    %32 = vector.broadcast %0 : vector<1x384xf32> to vector<4x384xf32>
    %33 = arith.mulf %31, %32 : vector<4x384xf32>
    %cst_38 = arith.constant dense<0.000000e+00> : vector<4xf32>
    %34 = vector.multi_reduction <add>, %33, %cst_38 [1] : vector<4x384xf32> to vector<4xf32>
    %35 = vector.shape_cast %34 : vector<4xf32> to vector<4x1xf32>
    %cst_39 = arith.constant 3.906250e-03 : f32
    %36 = vector.broadcast %cst_39 : f32 to vector<4x1xf32>
    %37 = arith.mulf %35, %36 : vector<4x1xf32>
    %38 = vector.broadcast %37 : vector<4x1xf32> to vector<4x384xf32>
    %39 = arith.subf %31, %38 : vector<4x384xf32>
    %40 = vector.broadcast %0 : vector<1x384xf32> to vector<4x384xf32>
    %41 = arith.mulf %39, %40 : vector<4x384xf32>
    %42 = arith.mulf %41, %41 : vector<4x384xf32>
    %cst_40 = arith.constant dense<0.000000e+00> : vector<4xf32>
    %43 = vector.multi_reduction <add>, %42, %cst_40 [1] : vector<4x384xf32> to vector<4xf32>
    %44 = vector.shape_cast %43 : vector<4xf32> to vector<4x1xf32>
    %cst_41 = arith.constant 3.906250e-03 : f32
    %45 = vector.broadcast %cst_41 : f32 to vector<4x1xf32>
    %46 = arith.mulf %44, %45 : vector<4x1xf32>
    %cst_42 = arith.constant 9.99999974E-6 : f32
    %47 = vector.broadcast %cst_42 : f32 to vector<4x1xf32>
    %48 = arith.addf %46, %47 : vector<4x1xf32>
    %49 = math.rsqrt %48 : vector<4x1xf32>
    %50 = vector.broadcast %49 : vector<4x1xf32> to vector<4x384xf32>
    %51 = arith.mulf %41, %50 : vector<4x384xf32>
    %cst_43 = arith.constant 0.000000e+00 : f32
    %52 = vector.broadcast %cst_43 : f32 to vector<4x384xf32>
    %53 = arith.maximumf %51, %52 : vector<4x384xf32>
    %54 = arith.truncf %53 : vector<4x384xf32> to vector<4x384xbf16>
    %c0_44 = arith.constant 0 : index
    %c128_45 = arith.constant 128 : index
    %55 = vector.load %arg6[%c0_44, %c128_45] : memref<4x640xbf16, #tpu.memory_space<vmem>>, vector<4x384xbf16>
    tpu.vector_store %arg6[%c0_44, %c128_45], %54 {strides = array<i32>} : memref<4x640xbf16, #tpu.memory_space<vmem>>, vector<4x384xbf16>,
    %c0_46 = arith.constant 0 : index
    %c109_47 = arith.constant 109 : index
    %56 = vector.load %arg6[%c0_46, %c109_47] : memref<4x640xbf16, #tpu.memory_space<vmem>>, vector<4x384xbf16>
    %c0_48 = arith.constant 0 : index
    %c0_49 = arith.constant 0 : index
    %57 = vector.load %arg7[%c0_48, %c0_49] : memref<144x384xbf16, #tpu.memory_space<vmem>>, vector<4x384xbf16>
    tpu.vector_store %arg7[%c0_48, %c0_49], %56 {strides = array<i32>} : memref<144x384xbf16, #tpu.memory_space<vmem>>, vector<4x384xbf16>,
    %c0_50 = arith.constant 0 : index
    %c110_51 = arith.constant 110 : index
    %58 = vector.load %arg6[%c0_50, %c110_51] : memref<4x640xbf16, #tpu.memory_space<vmem>>, vector<4x384xbf16>
    %c16_52 = arith.constant 16 : index
    %c0_53 = arith.constant 0 : index
    %59 = vector.load %arg7[%c16_52, %c0_53] : memref<144x384xbf16, #tpu.memory_space<vmem>>, vector<4x384xbf16>
    tpu.vector_store %arg7[%c16_52, %c0_53], %58 {strides = array<i32>} : memref<144x384xbf16, #tpu.memory_space<vmem>>, vector<4x384xbf16>,
    %c0_54 = arith.constant 0 : index
    %c111_55 = arith.constant 111 : index
    %60 = vector.load %arg6[%c0_54, %c111_55] : memref<4x640xbf16, #tpu.memory_space<vmem>>, vector<4x384xbf16>
    %c32_56 = arith.constant 32 : index
    %c0_57 = arith.constant 0 : index
    %61 = vector.load %arg7[%c32_56, %c0_57] : memref<144x384xbf16, #tpu.memory_space<vmem>>, vector<4x384xbf16>
    tpu.vector_store %arg7[%c32_56, %c0_57], %60 {strides = array<i32>} : memref<144x384xbf16, #tpu.memory_space<vmem>>, vector<4x384xbf16>,
    %c0_58 = arith.constant 0 : index
    %c127_59 = arith.constant 127 : index
    %62 = vector.load %arg6[%c0_58, %c127_59] : memref<4x640xbf16, #tpu.memory_space<vmem>>, vector<4x384xbf16>
    %c48_60 = arith.constant 48 : index
    %c0_61 = arith.constant 0 : index
    %63 = vector.load %arg7[%c48_60, %c0_61] : memref<144x384xbf16, #tpu.memory_space<vmem>>, vector<4x384xbf16>
    tpu.vector_store %arg7[%c48_60, %c0_61], %62 {strides = array<i32>} : memref<144x384xbf16, #tpu.memory_space<vmem>>, vector<4x384xbf16>,
    %c0_62 = arith.constant 0 : index
    %c128_63 = arith.constant 128 : index
    %64 = vector.load %arg6[%c0_62, %c128_63] : memref<4x640xbf16, #tpu.memory_space<vmem>>, vector<4x384xbf16>
    %c64_64 = arith.constant 64 : index
    %c0_65 = arith.constant 0 : index
    %65 = vector.load %arg7[%c64_64, %c0_65] : memref<144x384xbf16, #tpu.memory_space<vmem>>, vector<4x384xbf16>
    tpu.vector_store %arg7[%c64_64, %c0_65], %64 {strides = array<i32>} : memref<144x384xbf16, #tpu.memory_space<vmem>>, vector<4x384xbf16>,
    %c0_66 = arith.constant 0 : index
    %c129_67 = arith.constant 129 : index
    %66 = vector.load %arg6[%c0_66, %c129_67] : memref<4x640xbf16, #tpu.memory_space<vmem>>, vector<4x384xbf16>
    %c80_68 = arith.constant 80 : index
    %c0_69 = arith.constant 0 : index
    %67 = vector.load %arg7[%c80_68, %c0_69] : memref<144x384xbf16, #tpu.memory_space<vmem>>, vector<4x384xbf16>
    tpu.vector_store %arg7[%c80_68, %c0_69], %66 {strides = array<i32>} : memref<144x384xbf16, #tpu.memory_space<vmem>>, vector<4x384xbf16>,
    %c0_70 = arith.constant 0 : index
    %c145_71 = arith.constant 145 : index
    %68 = vector.load %arg6[%c0_70, %c145_71] : memref<4x640xbf16, #tpu.memory_space<vmem>>, vector<4x384xbf16>
    %c96_72 = arith.constant 96 : index
    %c0_73 = arith.constant 0 : index
    %69 = vector.load %arg7[%c96_72, %c0_73] : memref<144x384xbf16, #tpu.memory_space<vmem>>, vector<4x384xbf16>
    tpu.vector_store %arg7[%c96_72, %c0_73], %68 {strides = array<i32>} : memref<144x384xbf16, #tpu.memory_space<vmem>>, vector<4x384xbf16>,
    %c0_74 = arith.constant 0 : index
    %c146_75 = arith.constant 146 : index
    %70 = vector.load %arg6[%c0_74, %c146_75] : memref<4x640xbf16, #tpu.memory_space<vmem>>, vector<4x384xbf16>
    %c112_76 = arith.constant 112 : index
    %c0_77 = arith.constant 0 : index
    %71 = vector.load %arg7[%c112_76, %c0_77] : memref<144x384xbf16, #tpu.memory_space<vmem>>, vector<4x384xbf16>
    tpu.vector_store %arg7[%c112_76, %c0_77], %70 {strides = array<i32>} : memref<144x384xbf16, #tpu.memory_space<vmem>>, vector<4x384xbf16>,
    %c0_78 = arith.constant 0 : index
    %c147_79 = arith.constant 147 : index
    %72 = vector.load %arg6[%c0_78, %c147_79] : memref<4x640xbf16, #tpu.memory_space<vmem>>, vector<4x384xbf16>
    %c128_80 = arith.constant 128 : index
    %c0_81 = arith.constant 0 : index
    %73 = vector.load %arg7[%c128_80, %c0_81] : memref<144x384xbf16, #tpu.memory_space<vmem>>, vector<4x384xbf16>
    tpu.vector_store %arg7[%c128_80, %c0_81], %72 {strides = array<i32>} : memref<144x384xbf16, #tpu.memory_space<vmem>>, vector<4x384xbf16>,
    %c0_82 = arith.constant 0 : index
    %c0_83 = arith.constant 0 : index
    %74 = vector.load %arg4[%c0_82, %c0_83] : memref<4x144xbf16, #tpu.memory_space<vmem>>, vector<4x144xbf16>
    %c0_84 = arith.constant 0 : index
    %c0_85 = arith.constant 0 : index
    %75 = vector.load %arg7[%c0_84, %c0_85] : memref<144x384xbf16, #tpu.memory_space<vmem>>, vector<144x384xbf16>
    %cst_86 = arith.constant dense<0.000000e+00> : vector<4x384xf32>
    %76 = tpu.matmul %74, %75, %cst_86 {dimension_numbers = #tpu.dot_dimension_numbers<[1], [0], [0], [1], [0, 0, 1, 1], [], []>} : vector<4x144xbf16>, vector<144x384xbf16>, vector<4x384xf32> -> vector<4x384xf32>
    %77 = vector.broadcast %0 : vector<1x384xf32> to vector<4x384xf32>
    %78 = arith.mulf %76, %77 : vector<4x384xf32>
    %cst_87 = arith.constant dense<0.000000e+00> : vector<4xf32>
    %79 = vector.multi_reduction <add>, %78, %cst_87 [1] : vector<4x384xf32> to vector<4xf32>
    %80 = vector.shape_cast %79 : vector<4xf32> to vector<4x1xf32>
    %cst_88 = arith.constant 3.906250e-03 : f32
    %81 = vector.broadcast %cst_88 : f32 to vector<4x1xf32>
    %82 = arith.mulf %80, %81 : vector<4x1xf32>
    %83 = vector.broadcast %82 : vector<4x1xf32> to vector<4x384xf32>
    %84 = arith.subf %76, %83 : vector<4x384xf32>
    %85 = vector.broadcast %0 : vector<1x384xf32> to vector<4x384xf32>
    %86 = arith.mulf %84, %85 : vector<4x384xf32>
    %87 = arith.mulf %86, %86 : vector<4x384xf32>
    %cst_89 = arith.constant dense<0.000000e+00> : vector<4xf32>
    %88 = vector.multi_reduction <add>, %87, %cst_89 [1] : vector<4x384xf32> to vector<4xf32>
    %89 = vector.shape_cast %88 : vector<4xf32> to vector<4x1xf32>
    %cst_90 = arith.constant 3.906250e-03 : f32
    %90 = vector.broadcast %cst_90 : f32 to vector<4x1xf32>
    %91 = arith.mulf %89, %90 : vector<4x1xf32>
    %cst_91 = arith.constant 9.99999974E-6 : f32
    %92 = vector.broadcast %cst_91 : f32 to vector<4x1xf32>
    %93 = arith.addf %91, %92 : vector<4x1xf32>
    %94 = math.rsqrt %93 : vector<4x1xf32>
    %95 = vector.broadcast %94 : vector<4x1xf32> to vector<4x384xf32>
    %96 = arith.mulf %86, %95 : vector<4x384xf32>
    %97 = arith.addf %96, %8 : vector<4x384xf32>
    %cst_92 = arith.constant 0.000000e+00 : f32
    %98 = vector.broadcast %cst_92 : f32 to vector<4x384xf32>
    %99 = arith.maximumf %97, %98 : vector<4x384xf32>
    %c0_93 = arith.constant 0 : index
    %c0_94 = arith.constant 0 : index
    %c0_95 = arith.constant 0 : index
    %100 = vector.load %arg5[%c0_93, %c0_94, %c0_95] : memref<1x4x384xf32, #tpu.memory_space<vmem>>, vector<1x4x384xf32>
    %101 = vector.shape_cast %100 : vector<1x4x384xf32> to vector<4x384xf32>
    %102 = vector.shape_cast %99 : vector<4x384xf32> to vector<1x4x384xf32>
    tpu.vector_store %arg5[%c0_93, %c0_94, %c0_95], %102 {strides = array<i32>} : memref<1x4x384xf32, #tpu.memory_space<vmem>>, vector<1x4x384xf32>,
    return
  }
  func.func @transform_0(%arg0: i32) -> (i32, i32) {
    %c0_i32 = arith.constant 0 : i32
    %c0_i32_0 = arith.constant 0 : i32
    %c0_i32_1 = arith.constant 0 : i32
    return %c0_i32, %c0_i32_0 : i32, i32
  }
  func.func @transform_1(%arg0: i32) -> (i32, i32, i32) {
    %c0_i32 = arith.constant 0 : i32
    %c0_i32_0 = arith.constant 0 : i32
    %c0_i32_1 = arith.constant 0 : i32
    return %arg0, %c0_i32, %c0_i32_0 : i32, i32, i32
  }
  func.func @transform_2(%arg0: i32) -> (i32, i32) {
    %c0_i32 = arith.constant 0 : i32
    %c0_i32_0 = arith.constant 0 : i32
    %c0_i32_1 = arith.constant 0 : i32
    return %c0_i32, %c0_i32_0 : i32, i32
  }
  func.func @transform_3(%arg0: i32) -> (i32, i32) {
    %c0_i32 = arith.constant 0 : i32
    %c0_i32_0 = arith.constant 0 : i32
    %c0_i32_1 = arith.constant 0 : i32
    return %c0_i32, %c0_i32_0 : i32, i32
  }
  func.func @transform_4(%arg0: i32) -> (i32, i32, i32) {
    %c0_i32 = arith.constant 0 : i32
    %c0_i32_0 = arith.constant 0 : i32
    %c0_i32_1 = arith.constant 0 : i32
    return %arg0, %c0_i32, %c0_i32_0 : i32, i32, i32
  }
}

</mosaic_0001>

<bundles_post_ra>
// kernel: basic_block.1
= control target key start
LH: loop header
LB: loop body
LE: loop exit
PB: predicated region body
PF: predicated region fallthrough
CT: control target
= control target key end

     0   :  { %s1406_s15 = smov 0   ;;  %s1701_s0 = inlined_call_operand.vmem [shape: f32[1,384], index: 0, kind: input, shape index: {}]   ;;  %s1702_s1 = inlined_call_operand.vmem [shape: f32[2,4,384], index: 1, kind: input, shape index: {}]   ;;  %s1703_s2 = inlined_call_operand.vmem [shape: bf16[4,144], index: 2, kind: input, shape index: {}]   ;;  %s1704_s3 = inlined_call_operand.vmem [shape: bf16[4,144], index: 3, kind: input, shape index: {}]   ;;  %s1705_s4 = inlined_call_operand.vmem [shape: f32[2,4,384], index: 4, kind: output, shape index: {}]  }
   0x1 LB: > { %s1312_s16 = sadd.s32 4294967295, %s1369_s15   ;;  %p1316_p0 = scmp.ge.s32.totalorder %s1369_s15, 1  ;;  %s1369_s15 = sphi %s1406_s15, %s14_s15  }
   0x2   : > { %p162_p1 = scmp.lt.s32.totalorder %s1369_s15, 3 }
   0x4   : > { %p163_p2 = pnand %p1316_p0, %p162_p1 }
   0x5   : > { %p1416_p3 = scmp.lt.s32.totalorder (!%p163_p2), %s1312_s16, 1  ;;  %v244_v0 = vlaneseq (!%p163_p2)  ;;  %v1371_v1 = vmov (!%p163_p2), 0   ;;  %v1372_v2 = vmov (!%p163_p2), 1983009808   ;;  %s1373_s22 = smov (!%p163_p2), 18   ;;  %vm616_vm0 = vcmask (!%p163_p2), 130048  }
   0x6   : > { %166 = sbr.rel (%p163_p2) target bundleno = 1503 (0x5df), region = 36  ;;  %200 = vst [vmem:[#allocation2] sm:$0x3] (!%p163_p2), %v1371_v1  ;;  %v242_v3 = vunpack.c.l.s4 (!%p163_p2), %v1372_v2  ;;  %201 = vst [vmem:[#allocation2 + $0x8] sm:$0x3] (!%p163_p2), %v1371_v1  ;;  %661 = vmatprep.subr.bf16.mxu1 (!%p163_p2), %v1371_v1  ;;  %s1374_s23 = smov (!%p163_p2), 19  }
   0x7   : > { %202 = vst [vmem:[#allocation3] sm:$0xff] (!%p163_p2), %v1371_v1  ;;  %203 = vst [vmem:[#allocation3 + $0x8] sm:$0xff] (!%p163_p2), %v1371_v1  ;;  %v1456_v4 = vshrl.u32 (!%p163_p2), %v244_v0, 7  ;;  %s1375_s24 = smov (!%p163_p2), 17   ;;  %s1376_s25 = smov (!%p163_p2), 1   ;;  %vm285_vm1 = vcmask (!%p163_p2), 154624  }
   0x8   : > { %204 = vst [vmem:[#allocation3 + $0x10] sm:$0xff] (!%p163_p2), %v1371_v1  ;;  %205 = vst [vmem:[#allocation3 + $0x18] sm:$0xff] (!%p163_p2), %v1371_v1  ;;  %v243_v5 = vunpack.c.0.s8 (!%p163_p2), %v242_v3  ;;  %s1377_s26 = smov (!%p163_p2), 127   ;;  %s1378_s27 = smov (!%p163_p2), 111   ;;  %vm322_vm2 = vcmask (!%p163_p2), 146432   ;;  %vm359_vm3 = vcmask (!%p163_p2), 138240  }
   0x9   : > { %206 = vst [vmem:[#allocation3 + $0x20] sm:$0xff] (!%p163_p2), %v1371_v1  ;;  %207 = vst [vmem:[#allocation3 + $0x28] sm:$0xff] (!%p163_p2), %v1371_v1  ;;  %s1379_s28 = smov (!%p163_p2), 110   ;;  %s1380_s5 = smov (!%p163_p2), 109   ;;  %vm396_vm4 = vcmask (!%p163_p2), 7168   ;;  %vm457_vm5 = vcmask (!%p163_p2), 1039360  }
   0xa   : > { %208 = vst [vmem:[#allocation3 + $0x30] sm:$0xff] (!%p163_p2), %v1371_v1  ;;  %209 = vst [vmem:[#allocation3 + $0x38] sm:$0xff] (!%p163_p2), %v1371_v1  ;;  %v1467_v6 = vsub.s32 (!%p163_p2), %v243_v5, %v1456_v4  ;;  %v1512_v31 = vld.sshfl [vmem:[%s1703_s2] sm:$0x33 pattern:$0x76325410] (!%p163_p2) }
   0xb   : > { %210 = vst [vmem:[#allocation3 + $0x40] sm:$0xff] (!%p163_p2), %v1371_v1  ;;  %211 = vst [vmem:[#allocation3 + $0x48] sm:$0xff] (!%p163_p2), %v1371_v1  ;;  %v614_v32 = vcombine.high (!%p163_p2), %v1512_v31, %v1512_v31  ;;  %vm494_vm6 = vcmask (!%p163_p2), 908288   ;;  %vm531_vm7 = vcmask (!%p163_p2), 900096   ;;  %vm568_vm8 = vcmask (!%p163_p2), 891904  }
   0xc   : > { %212 = vst [vmem:[#allocation3 + $0x50] sm:$0xff] (!%p163_p2), %v1371_v1  ;;  %213 = vst [vmem:[#allocation3 + $0x58] sm:$0xff] (!%p163_p2), %v1371_v1  ;;  %vm720_vm9 = vcmask (!%p163_p2), 1043456  }
   0xd   : > { %214 = vst [vmem:[#allocation3 + $0x60] sm:$0xff] %v1371_v1  ;;  %215 = vst [vmem:[#allocation3 + $0x68] sm:$0xff] %v1371_v1  ;;  %s1708_s16 = smov (!%p1416_p3, %s1312_s16), 1  ;;  %1323 = vmatprep.mubr.msk.bf16.mxu0 %vm616_vm0, %v614_v32  ;;  %1324 = vmatprep.mubr.msk.bf16.mxu1 %vm616_vm0, %v614_v32 }
   0xe   : > { %216 = vst [vmem:[#allocation3 + $0x70] sm:$0xff] %v1371_v1  ;;  %217 = vst [vmem:[#allocation3 + $0x78] sm:$0xff] %v1371_v1  ;;  %s1333_s18 = smul.u32 12, %s1708_s16 }
   0xf   : > { %218 = vst [vmem:[#allocation3 + $0x80] sm:$0xff] %v1371_v1  ;;  %219 = vst [vmem:[#allocation3 + $0x88] sm:$0xff] %v1371_v1 }
  0x10   : > { %220 = vst [vmem:[#allocation3 + $0x90] sm:$0xff] %v1371_v1  ;;  %221 = vst [vmem:[#allocation3 + $0x98] sm:$0xff] %v1371_v1  ;;  %s1464_s21 = scalar_lea.vmem %s1702_s1, %s1333_s18  ;;  %s197_s12 = scalar_lea.vmem %s1705_s4, %s1333_s18 }
  0x11   : > { %222 = vst [vmem:[#allocation3 + $0xa0] sm:$0xff] %v1371_v1  ;;  %223 = vst [vmem:[#allocation3 + $0xa8] sm:$0xff] %v1371_v1  ;;  %v229_v7 = vld [vmem:[%s1464_s21] sm:$0xff]  ;;  %v230_v8 = vld [vmem:[%s1464_s21 + $0x8] sm:$0xf] }
  0x12   : > { %224 = vst [vmem:[#allocation3 + $0xb0] sm:$0xff] %v1371_v1  ;;  %225 = vst [vmem:[#allocation3 + $0xb8] sm:$0xff] %v1371_v1  ;;  %v1471_v9 = vcombine.high %v229_v7, %v229_v7  ;;  %v236_v10 = vpack.c.bf16 %v230_v8, %v230_v8 }
  0x13   : > { %226 = vst [vmem:[#allocation3 + $0xc0] sm:$0xff] %v1371_v1  ;;  %227 = vst [vmem:[#allocation3 + $0xc8] sm:$0xff] %v1371_v1 }
  0x14   : > { %228 = vst [vmem:[#allocation3 + $0xd0] sm:$0xff] %v1371_v1  ;;  %v1319_v11 = vpack.c.bf16 %v1471_v9, %v229_v7  ;;  %v254_v12 = vrot.slane %v236_v10, %v1467_v6 }
  0x16   : > { %v247_v13 = vrot.slane %v1319_v11, %v1467_v6 }
  0x18   : > { %v255_v14 = vcombine.low %v247_v13, %v254_v12 }
  0x1a   : > { %257 = vst [vmem:[#allocation2 + $0x2] sm:$0x3f] %v255_v14 }
  0x21   : > { %v295_v15 = vld [vmem:[#allocation2] sm:$0xff] }
  0x22   : > { %v304_v16 = vrot.slane %v295_v15, %v1467_v6  ;;  %v297_v17 = vcombine.high %v295_v15, %v295_v15  ;;  %v406_v21 = vld [vmem:[#allocation2 + $0x2] sm:$0x3f] }
  0x23   : > { %v415_v22 = vrot.slane %v406_v21, %v1467_v6  ;;  %1320 = vst.sshfl [vmem:[#allocation3 + $0x60] sm:$0x3 pattern:$0x76325410] %v406_v21  ;;  %v408_v24 = vcombine.high %v406_v21, %v406_v21  ;;  %v430_v25 = vld [vmem:[#allocation2 + $0x2] sm:$0xff] }
  0x24   : > { %314 = vrot.lane.b32.xlu0 %v304_v16, %s1373_s22  ;;  %277 = vrot.lane.b32.xlu1 %v304_v16, %s1374_s23  ;;  %v311_v18 = vrot.slane %v297_v17, %v1467_v6  ;;  %v312_v19 = vcombine.high %v304_v16, %v304_v16  ;;  %v439_v26 = vrot.slane %v430_v25, %v1467_v6 }
  0x25   : > { %v423_v23 = vcombine.high %v415_v22, %v415_v22  ;;  %1321 = vst.sshfl [vmem:[#allocation3 + $0x70] sm:$0x3 pattern:$0x76325410] %v408_v24  ;;  %v432_v27 = vcombine.high %v430_v25, %v430_v25 }
  0x26   : > { %v276_v20 = vcombine.high %v311_v18, %v311_v18  ;;  %v447_v28 = vcombine.high %v439_v26, %v439_v26 }
  0x27   : > { %428 = vst [vmem:[#allocation3 + $0x68] sm:$0x3] %v423_v23  ;;  %v446_v29 = vrot.slane %v432_v27, %v1467_v6 }
  0x28   : > { %351 = vrot.lane.b32.xlu0 %v304_v16, %s1375_s24  ;;  %318 = vrot.lane.b32.xlu1 %v311_v18, %s1373_s22 }
  0x29   : > { %v448_v30 = vcombine.high %v446_v29, %v446_v29 }
  0x2a   : > { %v591_v24 = vld [vmem:[#allocation3 + $0x60] sm:$0xff] }
  0x2c   : > { %388 = vrot.lane.b32.xlu0 %v304_v16, %s1376_s25  ;;  %355 = vrot.lane.b32.xlu1 %v311_v18, %s1375_s24  ;;  %v593_v21 = vld [vmem:[#allocation3 + $0x70] sm:$0xff] }
  0x2e   : > { %v592_v15 = vld [vmem:[#allocation3 + $0x68] sm:$0xff] }
  0x30   : > { %392 = vrot.lane.b32.xlu1 %v311_v18, %s1376_s25  ;;  %279 = vrot.lane.b32.xlu0 %v312_v19, %s1374_s23 }
  0x34   : > { %281 = vrot.lane.b32.xlu0 %v311_v18, %s1374_s23  ;;  %283 = vrot.lane.b32.xlu1 %v276_v20, %s1374_s23 }
  0x38   : > { %316 = vrot.lane.b32.xlu0 %v312_v19, %s1373_s22  ;;  %320 = vrot.lane.b32.xlu1 %v276_v20, %s1373_s22 }
  0x3c   : > { %353 = vrot.lane.b32.xlu0 %v312_v19, %s1375_s24  ;;  %357 = vrot.lane.b32.xlu1 %v276_v20, %s1375_s24 }
  0x40   : > { %390 = vrot.lane.b32.xlu0 %v312_v19, %s1376_s25  ;;  %394 = vrot.lane.b32.xlu1 %v276_v20, %s1376_s25 }
  0x44   : > { %451 = vrot.lane.b32.xlu0 %v447_v28, %s1377_s26  ;;  %453 = vrot.lane.b32.xlu1 %v446_v29, %s1377_s26 }
  0x48   : > { %449 = vrot.lane.b32.xlu0 %v439_v26, %s1377_s26  ;;  %455 = vrot.lane.b32.xlu1 %v448_v30, %s1377_s26 }
  0x4c   : > { %488 = vrot.lane.b32.xlu0 %v447_v28, %s1378_s27  ;;  %490 = vrot.lane.b32.xlu1 %v446_v29, %s1378_s27 }
  0x50   : > { %486 = vrot.lane.b32.xlu0 %v439_v26, %s1378_s27  ;;  %492 = vrot.lane.b32.xlu1 %v448_v30, %s1378_s27 }
  0x54   : > { %525 = vrot.lane.b32.xlu0 %v447_v28, %s1379_s28  ;;  %527 = vrot.lane.b32.xlu1 %v446_v29, %s1379_s28 }
  0x58   : > { %523 = vrot.lane.b32.xlu0 %v439_v26, %s1379_s28  ;;  %529 = vrot.lane.b32.xlu1 %v448_v30, %s1379_s28 }
  0x5c   : > { %562 = vrot.lane.b32.xlu0 %v447_v28, %s1380_s5  ;;  %564 = vrot.lane.b32.xlu1 %v446_v29, %s1380_s5 }
  0x60   : > { %560 = vrot.lane.b32.xlu0 %v439_v26, %s1380_s5  ;;  %566 = vrot.lane.b32.xlu1 %v448_v30, %s1380_s5 }
  0x96   : > { %v315_v33 = vpop.permute.xlu0 %314  ;;  %v278_v34 = vpop.permute.xlu1 %277 }
  0x9a   : > { %v352_v35 = vpop.permute.xlu0 %351  ;;  %v319_v36 = vpop.permute.xlu1 %318 }
  0x9e   : > { %v389_v37 = vpop.permute.xlu0 %388  ;;  %v356_v38 = vpop.permute.xlu1 %355 }
  0xa2   : > { %v393_v39 = vpop.permute.xlu1 %392  ;;  %v280_v40 = vpop.permute.xlu0 %279 }
  0xa3   : > { %v286_v41 = vsel %vm285_vm1, %v278_v34, %v280_v40 }
  0xa4   : > { %292 = vst [vmem:[#allocation3] sm:$0x3] %v286_v41 }
  0xa6   : > { %v282_v42 = vpop.permute.xlu0 %281  ;;  %v284_v43 = vpop.permute.xlu1 %283 }
  0xa7   : > { %v287_v44 = vsel %vm285_vm1, %v280_v40, %v282_v42  ;;  %v288_v45 = vsel %vm285_vm1, %v282_v42, %v284_v43 }
  0xa8   : > { %293 = vst [vmem:[#allocation3 + $0x8] sm:$0x3] %v287_v44  ;;  %294 = vst [vmem:[#allocation3 + $0x10] sm:$0x3] %v288_v45 }
  0xaa   : > { %v317_v46 = vpop.permute.xlu0 %316  ;;  %v321_v47 = vpop.permute.xlu1 %320 }
  0xab   : > { %v323_v48 = vsel %vm322_vm2, %v315_v33, %v317_v46  ;;  %v324_v49 = vsel %vm322_vm2, %v317_v46, %v319_v36  ;;  %v325_v50 = vsel %vm322_vm2, %v319_v36, %v321_v47  ;;  %v579_v58 = vld [vmem:[#allocation3] sm:$0xff] }
  0xac   : > { %329 = vst [vmem:[#allocation3 + $0x18] sm:$0x3] %v323_v48  ;;  %330 = vst [vmem:[#allocation3 + $0x20] sm:$0x3] %v324_v49 }
  0xad   : > { %331 = vst [vmem:[#allocation3 + $0x28] sm:$0x3] %v325_v50 }
  0xae   : > { %v354_v51 = vpop.permute.xlu0 %353  ;;  %v358_v52 = vpop.permute.xlu1 %357 }
  0xaf   : > { %v360_v53 = vsel %vm359_vm3, %v352_v35, %v354_v51  ;;  %v361_v54 = vsel %vm359_vm3, %v354_v51, %v356_v38  ;;  %v362_v55 = vsel %vm359_vm3, %v356_v38, %v358_v52  ;;  %v580_v56 = vld [vmem:[#allocation3 + $0x8] sm:$0xff]  ;;  %v581_v57 = vld [vmem:[#allocation3 + $0x10] sm:$0xff] }
  0xb0   : > { %366 = vst [vmem:[#allocation3 + $0x30] sm:$0x3] %v360_v53  ;;  %367 = vst [vmem:[#allocation3 + $0x38] sm:$0x3] %v361_v54  ;;  %620 = vmatprep.subr.bf16.mxu0 %v580_v56  ;;  %662 = vmatpush1.bf16.msra.mxu1 %v581_v57  ;;  %v704_v57 = vsub.s32 0, %v1456_v4 }
  0xb1   : > { %368 = vst [vmem:[#allocation3 + $0x40] sm:$0x3] %v362_v55  ;;  %621 = vmatpush1.bf16.msra.mxu0 %v579_v58  ;;  %663 = vmatprep.subr.bf16.mxu1 %v1371_v1  ;;  %v712_v58 = vsub.s32 2, %v1456_v4 }
  0xb2   : > { %v391_v59 = vpop.permute.xlu0 %390  ;;  %v395_v60 = vpop.permute.xlu1 %394 }
  0xb3   : > { %v397_v61 = vsel %vm396_vm4, %v389_v37, %v391_v59  ;;  %v398_v62 = vsel %vm396_vm4, %v391_v59, %v393_v39  ;;  %v399_v63 = vsel %vm396_vm4, %v393_v39, %v395_v60  ;;  %v583_v0 = vld [vmem:[#allocation3 + $0x20] sm:$0xff]  ;;  %v582_v3 = vld [vmem:[#allocation3 + $0x18] sm:$0xff]  ;;  %v708_v60 = vsub.s32 1, %v1456_v4 }
  0xb4   : > { %v584_v2 = vld [vmem:[#allocation3 + $0x28] sm:$0xff]  ;;  %403 = vst [vmem:[#allocation3 + $0x48] sm:$0x3] %v397_v61  ;;  %404 = vst [vmem:[#allocation3 + $0x50] sm:$0x3] %v398_v62  ;;  %622 = vmatprep.subr.bf16.mxu0 %v583_v0 }
  0xb5   : > { %405 = vst [vmem:[#allocation3 + $0x58] sm:$0x3] %v399_v63  ;;  %664 = vmatpush1.bf16.msra.mxu1 %v584_v2  ;;  %623 = vmatpush1.bf16.msra.mxu0 %v582_v3  ;;  %v199_v59 = vld [vmem:[%s1701_s0] sm:$0x7] }
  0xb6   : > { %665 = vmatprep.subr.bf16.mxu1 %v1371_v1  ;;  %v452_v5 = vpop.permute.xlu0 %451  ;;  %v454_v7 = vpop.permute.xlu1 %453  ;;  %v1563_v61 = vrot.slane %v199_v59, %v704_v57  ;;  %v1565_v62 = vrot.slane %v199_v59, %v712_v58  ;;  %v1567_v63 = vrot.slane %v199_v59, %v708_v60 }
  0xb7   : > { %v459_v8 = vsel %vm457_vm5, %v452_v5, %v454_v7  ;;  %v586_v10 = vld [vmem:[#allocation3 + $0x38] sm:$0xff]  ;;  %v585_v12 = vld [vmem:[#allocation3 + $0x30] sm:$0xff] }
  0xb8   : > { %v587_v11 = vld [vmem:[#allocation3 + $0x40] sm:$0xff]  ;;  %465 = vst [vmem:[#allocation3 + $0x80] sm:$0x3] %v459_v8  ;;  %624 = vmatprep.subr.bf16.mxu0 %v586_v10 }
  0xb9   : > { %666 = vmatpush1.bf16.msra.mxu1 %v587_v11  ;;  %625 = vmatpush1.bf16.msra.mxu0 %v585_v12 }
  0xba   : > { %667 = vmatprep.subr.bf16.mxu1 %v1371_v1  ;;  %v450_v13 = vpop.permute.xlu0 %449  ;;  %v456_v14 = vpop.permute.xlu1 %455 }
  0xbb   : > { %v458_v16 = vsel %vm457_vm5, %v450_v13, %v452_v5  ;;  %v460_v17 = vsel %vm457_vm5, %v454_v7, %v456_v14  ;;  %v589_v18 = vld [vmem:[#allocation3 + $0x50] sm:$0xff]  ;;  %v588_v20 = vld [vmem:[#allocation3 + $0x48] sm:$0xff] }
  0xbc   : > { %v590_v19 = vld [vmem:[#allocation3 + $0x58] sm:$0xff]  ;;  %464 = vst [vmem:[#allocation3 + $0x78] sm:$0x3] %v458_v16  ;;  %466 = vst [vmem:[#allocation3 + $0x88] sm:$0x3] %v460_v17  ;;  %626 = vmatprep.subr.bf16.mxu0 %v589_v18 }
  0xbd   : > { %668 = vmatpush1.bf16.msra.mxu1 %v590_v19  ;;  %627 = vmatpush1.bf16.msra.mxu0 %v588_v20 }
  0xbe   : > { %669 = vmatprep.subr.bf16.mxu1 %v1371_v1  ;;  %v489_v22 = vpop.permute.xlu0 %488  ;;  %v491_v23 = vpop.permute.xlu1 %490  ;;  %628 = vmatprep.subr.bf16.mxu0 %v592_v15 }
  0xbf   : > { %v496_v25 = vsel %vm494_vm6, %v489_v22, %v491_v23  ;;  %v595_v26 = vld [vmem:[#allocation3 + $0x80] sm:$0xff] }
  0xc0   : > { %502 = vst [vmem:[#allocation3 + $0x98] sm:$0x3] %v496_v25 }
  0xc1   : > { %670 = vmatpush1.bf16.msra.mxu1 %v593_v21  ;;  %629 = vmatpush1.bf16.msra.mxu0 %v591_v24 }
  0xc2   : > { %671 = vmatprep.subr.bf16.mxu1 %v1371_v1  ;;  %v487_v27 = vpop.permute.xlu0 %486  ;;  %630 = vmatprep.subr.bf16.mxu0 %v595_v26  ;;  %v493_v28 = vpop.permute.xlu1 %492 }
  0xc3   : > { %v495_v29 = vsel %vm494_vm6, %v487_v27, %v489_v22  ;;  %v497_v30 = vsel %vm494_vm6, %v491_v23, %v493_v28  ;;  %v596_v32 = vld [vmem:[#allocation3 + $0x88] sm:$0xff]  ;;  %v594_v33 = vld [vmem:[#allocation3 + $0x78] sm:$0xff] }
  0xc4   : > { %501 = vst [vmem:[#allocation3 + $0x90] sm:$0x3] %v495_v29  ;;  %503 = vst [vmem:[#allocation3 + $0xa0] sm:$0x3] %v497_v30 }
  0xc5   : > { %672 = vmatpush1.bf16.msra.mxu1 %v596_v32  ;;  %631 = vmatpush1.bf16.msra.mxu0 %v594_v33 }
  0xc6   : > { %673 = vmatprep.subr.bf16.mxu1 %v1371_v1  ;;  %v526_v34 = vpop.permute.xlu0 %525  ;;  %v528_v35 = vpop.permute.xlu1 %527 }
  0xc7   : > { %v533_v36 = vsel %vm531_vm7, %v526_v34, %v528_v35  ;;  %v598_v37 = vld [vmem:[#allocation3 + $0x98] sm:$0xff] }
  0xc8   : > { %539 = vst [vmem:[#allocation3 + $0xb0] sm:$0x3] %v533_v36  ;;  %632 = vmatprep.subr.bf16.mxu0 %v598_v37 }
  0xca   : > { %v524_v38 = vpop.permute.xlu0 %523  ;;  %v530_v39 = vpop.permute.xlu1 %529 }
  0xcb   : > { %v532_v40 = vsel %vm531_vm7, %v524_v38, %v526_v34  ;;  %v534_v41 = vsel %vm531_vm7, %v528_v35, %v530_v39  ;;  %v597_v42 = vld [vmem:[#allocation3 + $0x90] sm:$0xff]  ;;  %v599_v43 = vld [vmem:[#allocation3 + $0xa0] sm:$0xff] }
  0xcc   : > { %538 = vst [vmem:[#allocation3 + $0xa8] sm:$0x3] %v532_v40  ;;  %540 = vst [vmem:[#allocation3 + $0xb8] sm:$0x3] %v534_v41  ;;  %633 = vmatpush1.bf16.msra.mxu0 %v597_v42  ;;  %674 = vmatpush1.bf16.msra.mxu1 %v599_v43 }
  0xcd   : > { %675 = vmatprep.subr.bf16.mxu1 %v1371_v1 }
  0xce   : > { %v563_v44 = vpop.permute.xlu0 %562  ;;  %v565_v45 = vpop.permute.xlu1 %564 }
  0xcf   : > { %v570_v46 = vsel %vm568_vm8, %v563_v44, %v565_v45  ;;  %v601_v47 = vld [vmem:[#allocation3 + $0xb0] sm:$0xff] }
  0xd0   : > { %576 = vst [vmem:[#allocation3 + $0xc8] sm:$0x3] %v570_v46  ;;  %634 = vmatprep.subr.bf16.mxu0 %v601_v47 }
  0xd2   : > { %v561_v48 = vpop.permute.xlu0 %560  ;;  %v567_v49 = vpop.permute.xlu1 %566 }
  0xd3   : > { %v569_v50 = vsel %vm568_vm8, %v561_v48, %v563_v44  ;;  %v571_v51 = vsel %vm568_vm8, %v565_v45, %v567_v49  ;;  %v600_v52 = vld [vmem:[#allocation3 + $0xa8] sm:$0xff]  ;;  %v602_v53 = vld [vmem:[#allocation3 + $0xb8] sm:$0xff] }
  0xd4   : > { %575 = vst [vmem:[#allocation3 + $0xc0] sm:$0x3] %v569_v50  ;;  %577 = vst [vmem:[#allocation3 + $0xd0] sm:$0x3] %v571_v51  ;;  %635 = vmatpush1.bf16.msra.mxu0 %v600_v52  ;;  %676 = vmatpush1.bf16.msra.mxu1 %v602_v53 }
  0xd5   : > { %677 = vmatprep.subr.bf16.mxu1 %v1371_v1 }
  0xd7   : > { %v604_v54 = vld [vmem:[#allocation3 + $0xc8] sm:$0xff] }
  0xd8   : > { %636 = vmatprep.subr.bf16.mxu0 %v604_v54 }
  0xdb   : > { %v603_v55 = vld [vmem:[#allocation3 + $0xc0] sm:$0xff]  ;;  %v605_v56 = vld [vmem:[#allocation3 + $0xd0] sm:$0xff] }
  0xdc   : > { %637 = vmatpush1.bf16.msra.mxu0 %v603_v55  ;;  %678 = vmatpush1.bf16.msra.mxu1 %v605_v56 }
  0xdd   : > { %1172 = vmatprep.subr.bf16.mxu1 %v1371_v1 }
  0xdf   : > { %653 = vmatmul.mubr.bf16.vlgmr.msra.gmra.mrb[0].mxu0 %v1512_v31  ;;  %694 = vmatmul.mubr.bf16.vlgmr.msra.gmra.mrb[0].mxu1 %v1512_v31 }
 0x1b2   : > { %v654_v0 = vpop.f32.mrb[0].mxu0  ;;  %v695_v2 = vpop.f32.mrb[0].mxu1 }
 0x1b3   : > { %v717_v31 = vmul.f32 %v1563_v61, %v654_v0  ;;  %v719_v3 = vmul.f32 %v1565_v62, %v695_v2  ;;  %v656_v5 = vpop.f32.mrb[1].mxu0  ;;  %v697_v7 = vpop.f32.mrb[1].mxu1 }
 0x1b4   : > { %v718_v8 = vmul.f32 %v1567_v63, %v656_v5  ;;  %v658_v10 = vpop.f32.mrb[2].mxu0  ;;  %v698_v11 = vpop.f32.mrb[2].mxu1 }
 0x1b5   : > { %v721_v4 = vsel %vm720_vm9, %v717_v31, 0.0  ;;  %v659_v12 = vpop.f32.mrb[3].mxu0  ;;  %v699_v13 = vpop.f32.mrb[3].mxu1  ;;  %v724_v15 = vsel %vm720_vm9, %v719_v3, 0.0 }
 0x1b6   : > { %v722_v14 = vsel %vm720_vm9, %v718_v8, 0.0 }
 0x1b7   : > { %v723_v16 = vadd.f32 %v722_v14, %v721_v4 }
 0x1b9   : > { %v725_v17 = vadd.f32 %v724_v15, %v723_v16 }
 0x1bb   : > { %726 = vadd.xlane.f32.xlu0 %v725_v17 }
 0x248   : > { %v727_v18 = vpop.xlane.xlu0 %726 }
 0x249   : > { %v728_v19 = vmul.f32 0.00390625, %v727_v18 }
 0x24b   : > { %v729_v20 = vsub.f32 %v654_v0, %v728_v19  ;;  %v730_v21 = vsub.f32 %v656_v5, %v728_v19  ;;  %v731_v22 = vsub.f32 %v695_v2, %v728_v19  ;;  %v1620_v5 = vld.sshfl [vmem:[%s1704_s3] sm:$0x33 pattern:$0x76325410] }
 0x24c   : > { %v1126_v7 = vcombine.high %v1620_v5, %v1620_v5 }
 0x24d   : > { %v732_v23 = vmul.f32 %v729_v20, %v1563_v61  ;;  %v733_v24 = vmul.f32 %v730_v21, %v1567_v63  ;;  %v734_v25 = vmul.f32 %v731_v22, %v1565_v62 }
 0x24e   : > { %1329 = vmatprep.mubr.msk.bf16.mxu0 %vm616_vm0, %v1126_v7  ;;  %1330 = vmatprep.mubr.msk.bf16.mxu1 %vm616_vm0, %v1126_v7 }
 0x24f   : > { %v735_v26 = vmul.f32 %v732_v23, %v732_v23  ;;  %v736_v27 = vmul.f32 %v733_v24, %v733_v24  ;;  %v737_v28 = vmul.f32 %v734_v25, %v734_v25 }
 0x251   : > { %v738_v29 = vsel %vm720_vm9, %v735_v26, 0.0  ;;  %v739_v30 = vsel %vm720_vm9, %v736_v27, 0.0  ;;  %v741_v33 = vsel %vm720_vm9, %v737_v28, 0.0 }
 0x252   : > { %v740_v32 = vadd.f32 %v739_v30, %v738_v29 }
 0x254   : > { %v742_v34 = vadd.f32 %v741_v33, %v740_v32 }
 0x256   : > { %743 = vadd.xlane.f32.xlu1 %v742_v34 }
 0x2e3   : > { %v744_v35 = vpop.xlane.xlu1 %743 }
 0x2e4   : > { %v745_v36 = vmul.f32 0.00390625, %v744_v35 }
 0x2e6   : > { %v746_v37 = vadd.f32 1e-05, %v745_v36 }
 0x2e8   : > { %1357 = vrsqrt.f32 %v746_v37 }
 0x2f2   : > { %v1358_v38 = vpop.eup %1357 }
 0x2f3   : > { %v748_v39 = vmul.f32 %v1358_v38, %v732_v23  ;;  %v749_v40 = vmul.f32 %v1358_v38, %v733_v24  ;;  %v750_v41 = vmul.f32 %v1358_v38, %v734_v25 }
 0x2f5   : > { %v751_v42 = vmax.f32 %v748_v39, 0.0  ;;  %v752_v43 = vmax.f32 %v749_v40, 0.0  ;;  %v753_v44 = vmax.f32 %v750_v41, 0.0 }
 0x2f7   : > { %v756_v45 = vpack.c.bf16 %v753_v44, %v753_v44  ;;  %v1325_v46 = vpack.c.bf16 %v752_v43, %v751_v42 }
 0x2f9   : > { %v767_v47 = vrot.slane %v1325_v46, %v1467_v6  ;;  %v774_v48 = vrot.slane %v756_v45, %v1467_v6 }
 0x2fb   : > { %v775_v49 = vcombine.low %v767_v47, %v774_v48 }
 0x2fd   : > { %777 = vst [vmem:[#allocation2 + $0x2] sm:$0x3f] %v775_v49 }
 0x304   : > { %v778_v50 = vld [vmem:[#allocation2] sm:$0xff] }
 0x305   : > { %v922_v51 = vld [vmem:[#allocation2 + $0x2] sm:$0x3f]  ;;  %v787_v52 = vrot.slane %v778_v50, %v1467_v6  ;;  %v780_v53 = vcombine.high %v778_v50, %v778_v50 }
 0x306   : > { %1326 = vst.sshfl [vmem:[#allocation3 + $0x60] sm:$0x3 pattern:$0x76325410] %v922_v51  ;;  %v931_v54 = vrot.slane %v922_v51, %v1467_v6  ;;  %v924_v55 = vcombine.high %v922_v51, %v922_v51  ;;  %v946_v58 = vld [vmem:[#allocation2 + $0x2] sm:$0xff] }
 0x307   : > { %797 = vrot.lane.b32.xlu0 %v787_v52, %s1374_s23  ;;  %v794_v56 = vrot.slane %v780_v53, %v1467_v6  ;;  %v948_v59 = vcombine.high %v946_v58, %v946_v58  ;;  %v955_v60 = vrot.slane %v946_v58, %v1467_v6  ;;  %v795_v2 = vcombine.high %v787_v52, %v787_v52 }
 0x308   : > { %v939_v57 = vcombine.high %v931_v54, %v931_v54  ;;  %1327 = vst.sshfl [vmem:[#allocation3 + $0x70] sm:$0x3 pattern:$0x76325410] %v924_v55 }
 0x309   : > { %801 = vrot.lane.b32.xlu1 %v794_v56, %s1374_s23  ;;  %v962_v0 = vrot.slane %v948_v59, %v1467_v6  ;;  %v796_v31 = vcombine.high %v794_v56, %v794_v56  ;;  %v963_v6 = vcombine.high %v955_v60, %v955_v60 }
 0x30a   : > { %944 = vst [vmem:[#allocation3 + $0x68] sm:$0x3] %v939_v57 }
 0x30b   : > { %833 = vrot.lane.b32.xlu0 %v787_v52, %s1373_s22  ;;  %v964_v3 = vcombine.high %v962_v0, %v962_v0 }
 0x30d   : > { %837 = vrot.lane.b32.xlu1 %v794_v56, %s1373_s22 }
 0x30f   : > { %869 = vrot.lane.b32.xlu0 %v787_v52, %s1375_s24 }
 0x311   : > { %873 = vrot.lane.b32.xlu1 %v794_v56, %s1375_s24  ;;  %v1104_v57 = vld [vmem:[#allocation3 + $0x68] sm:$0xff] }
 0x313   : > { %905 = vrot.lane.b32.xlu0 %v787_v52, %s1376_s25 }
 0x315   : > { %909 = vrot.lane.b32.xlu1 %v794_v56, %s1376_s25 }
 0x317   : > { %965 = vrot.lane.b32.xlu0 %v955_v60, %s1377_s26 }
 0x319   : > { %969 = vrot.lane.b32.xlu1 %v962_v0, %s1377_s26 }
 0x31b   : > { %1001 = vrot.lane.b32.xlu0 %v955_v60, %s1378_s27 }
 0x31d   : > { %1005 = vrot.lane.b32.xlu1 %v962_v0, %s1378_s27 }
 0x31f   : > { %799 = vrot.lane.b32.xlu0 %v795_v2, %s1374_s23 }
 0x321   : > { %1041 = vrot.lane.b32.xlu1 %v962_v0, %s1379_s28 }
 0x323   : > { %835 = vrot.lane.b32.xlu0 %v795_v2, %s1373_s22 }
 0x325   : > { %803 = vrot.lane.b32.xlu1 %v796_v31, %s1374_s23 }
 0x327   : > { %871 = vrot.lane.b32.xlu0 %v795_v2, %s1375_s24 }
 0x329   : > { %839 = vrot.lane.b32.xlu1 %v796_v31, %s1373_s22 }
 0x32b   : > { %907 = vrot.lane.b32.xlu0 %v795_v2, %s1376_s25 }
 0x32d   : > { %875 = vrot.lane.b32.xlu1 %v796_v31, %s1375_s24 }
 0x32f   : > { %1037 = vrot.lane.b32.xlu0 %v955_v60, %s1379_s28 }
 0x331   : > { %911 = vrot.lane.b32.xlu1 %v796_v31, %s1376_s25  ;;  %v1103_v31 = vld [vmem:[#allocation3 + $0x60] sm:$0xff] }
 0x333   : > { %967 = vrot.lane.b32.xlu0 %v963_v6, %s1377_s26 }
 0x335   : > { %1077 = vrot.lane.b32.xlu1 %v962_v0, %s1380_s5 }
 0x337   : > { %1003 = vrot.lane.b32.xlu0 %v963_v6, %s1378_s27 }
 0x339   : > { %971 = vrot.lane.b32.xlu1 %v964_v3, %s1377_s26 }
 0x33b   : > { %1039 = vrot.lane.b32.xlu0 %v963_v6, %s1379_s28 }
 0x33d   : > { %1007 = vrot.lane.b32.xlu1 %v964_v3, %s1378_s27 }
 0x33f   : > { %1075 = vrot.lane.b32.xlu0 %v963_v6, %s1380_s5 }
 0x341   : > { %1043 = vrot.lane.b32.xlu1 %v964_v3, %s1379_s28 }
 0x343   : > { %1073 = vrot.lane.b32.xlu0 %v955_v60, %s1380_s5 }
 0x345   : > { %1079 = vrot.lane.b32.xlu1 %v964_v3, %s1380_s5 }
 0x379   : > { %v798_v8 = vpop.permute.xlu0 %797 }
 0x37b   : > { %v802_v10 = vpop.permute.xlu1 %801 }
 0x37d   : > { %v834_v11 = vpop.permute.xlu0 %833 }
 0x37f   : > { %v838_v4 = vpop.permute.xlu1 %837 }
 0x381   : > { %v870_v12 = vpop.permute.xlu0 %869 }
 0x383   : > { %v874_v13 = vpop.permute.xlu1 %873 }
 0x385   : > { %v906_v14 = vpop.permute.xlu0 %905 }
 0x387   : > { %v910_v15 = vpop.permute.xlu1 %909 }
 0x389   : > { %v966_v16 = vpop.permute.xlu0 %965 }
 0x38b   : > { %v1629_v17 = vpop.permute.xlu1 %969 }
 0x38d   : > { %v1631_v18 = vpop.permute.xlu0 %1001 }
 0x38f   : > { %v1633_v19 = vpop.permute.xlu1 %1005 }
 0x391   : > { %v800_v20 = vpop.permute.xlu0 %799 }
 0x392   : > { %v805_v21 = vsel %vm285_vm1, %v798_v8, %v800_v20  ;;  %v806_v22 = vsel %vm285_vm1, %v800_v20, %v802_v10 }
 0x393   : > { %811 = vst [vmem:[#allocation3] sm:$0x3] %v805_v21  ;;  %812 = vst [vmem:[#allocation3 + $0x8] sm:$0x3] %v806_v22  ;;  %v1637_v23 = vpop.permute.xlu1 %1041 }
 0x395   : > { %v836_v24 = vpop.permute.xlu0 %835 }
 0x396   : > { %v841_v25 = vsel %vm322_vm2, %v834_v11, %v836_v24  ;;  %v842_v26 = vsel %vm322_vm2, %v836_v24, %v838_v4 }
 0x397   : > { %847 = vst [vmem:[#allocation3 + $0x18] sm:$0x3] %v841_v25  ;;  %848 = vst [vmem:[#allocation3 + $0x20] sm:$0x3] %v842_v26  ;;  %v804_v27 = vpop.permute.xlu1 %803 }
 0x398   : > { %v807_v28 = vsel %vm285_vm1, %v802_v10, %v804_v27 }
 0x399   : > { %813 = vst [vmem:[#allocation3 + $0x10] sm:$0x3] %v807_v28  ;;  %v872_v29 = vpop.permute.xlu0 %871 }
 0x39a   : > { %v877_v30 = vsel %vm359_vm3, %v870_v12, %v872_v29  ;;  %v878_v32 = vsel %vm359_vm3, %v872_v29, %v874_v13  ;;  %v1092_v33 = vld [vmem:[#allocation3 + $0x8] sm:$0xff]  ;;  %v1091_v34 = vld [vmem:[#allocation3] sm:$0xff] }
 0x39b   : > { %883 = vst [vmem:[#allocation3 + $0x30] sm:$0x3] %v877_v30  ;;  %884 = vst [vmem:[#allocation3 + $0x38] sm:$0x3] %v878_v32  ;;  %1131 = vmatprep.subr.bf16.mxu0 %v1092_v33  ;;  %v840_v35 = vpop.permute.xlu1 %839 }
 0x39c   : > { %v843_v36 = vsel %vm322_vm2, %v838_v4, %v840_v35  ;;  %1132 = vmatpush1.bf16.msra.mxu0 %v1091_v34 }
 0x39d   : > { %849 = vst [vmem:[#allocation3 + $0x28] sm:$0x3] %v843_v36  ;;  %v908_v37 = vpop.permute.xlu0 %907 }
 0x39e   : > { %v913_v38 = vsel %vm396_vm4, %v906_v14, %v908_v37  ;;  %v914_v39 = vsel %vm396_vm4, %v908_v37, %v910_v15  ;;  %v1095_v40 = vld [vmem:[#allocation3 + $0x20] sm:$0xff]  ;;  %v1094_v41 = vld [vmem:[#allocation3 + $0x18] sm:$0xff]  ;;  %v1105_v14 = vld [vmem:[#allocation3 + $0x70] sm:$0xff] }
 0x39f   : > { %919 = vst [vmem:[#allocation3 + $0x48] sm:$0x3] %v913_v38  ;;  %920 = vst [vmem:[#allocation3 + $0x50] sm:$0x3] %v914_v39  ;;  %1133 = vmatprep.subr.bf16.mxu0 %v1095_v40  ;;  %v876_v42 = vpop.permute.xlu1 %875 }
 0x3a0   : > { %v879_v43 = vsel %vm359_vm3, %v874_v13, %v876_v42  ;;  %1134 = vmatpush1.bf16.msra.mxu0 %v1094_v41  ;;  %v1093_v44 = vld [vmem:[#allocation3 + $0x10] sm:$0xff] }
 0x3a1   : > { %885 = vst [vmem:[#allocation3 + $0x40] sm:$0x3] %v879_v43  ;;  %v1038_v45 = vpop.permute.xlu0 %1037  ;;  %1173 = vmatpush1.bf16.msra.mxu1 %v1093_v44 }
 0x3a2   : > { %v1098_v46 = vld [vmem:[#allocation3 + $0x38] sm:$0xff]  ;;  %v1097_v47 = vld [vmem:[#allocation3 + $0x30] sm:$0xff]  ;;  %1174 = vmatprep.subr.bf16.mxu1 %v1371_v1 }
 0x3a3   : > { %1135 = vmatprep.subr.bf16.mxu0 %v1098_v46  ;;  %v912_v48 = vpop.permute.xlu1 %911 }
 0x3a4   : > { %v915_v49 = vsel %vm396_vm4, %v910_v15, %v912_v48  ;;  %1136 = vmatpush1.bf16.msra.mxu0 %v1097_v47  ;;  %v1096_v50 = vld [vmem:[#allocation3 + $0x28] sm:$0xff] }
 0x3a5   : > { %921 = vst [vmem:[#allocation3 + $0x58] sm:$0x3] %v915_v49  ;;  %v968_v51 = vpop.permute.xlu0 %967  ;;  %1175 = vmatpush1.bf16.msra.mxu1 %v1096_v50 }
 0x3a6   : > { %v973_v52 = vsel %vm457_vm5, %v966_v16, %v968_v51  ;;  %v974_v53 = vsel %vm457_vm5, %v968_v51, %v1629_v17  ;;  %v1101_v54 = vld [vmem:[#allocation3 + $0x50] sm:$0xff]  ;;  %v1100_v55 = vld [vmem:[#allocation3 + $0x48] sm:$0xff]  ;;  %1176 = vmatprep.subr.bf16.mxu1 %v1371_v1 }
 0x3a7   : > { %979 = vst [vmem:[#allocation3 + $0x78] sm:$0x3] %v973_v52  ;;  %980 = vst [vmem:[#allocation3 + $0x80] sm:$0x3] %v974_v53  ;;  %1137 = vmatprep.subr.bf16.mxu0 %v1101_v54  ;;  %v1078_v56 = vpop.permute.xlu1 %1077 }
 0x3a8   : > { %1138 = vmatpush1.bf16.msra.mxu0 %v1100_v55  ;;  %v1099_v58 = vld [vmem:[#allocation3 + $0x40] sm:$0xff] }
 0x3a9   : > { %v1004_v59 = vpop.permute.xlu0 %1003  ;;  %1139 = vmatprep.subr.bf16.mxu0 %v1104_v57  ;;  %1177 = vmatpush1.bf16.msra.mxu1 %v1099_v58 }
 0x3aa   : > { %v1009_v60 = vsel %vm494_vm6, %v1631_v18, %v1004_v59  ;;  %v1010_v0 = vsel %vm494_vm6, %v1004_v59, %v1633_v19  ;;  %1178 = vmatprep.subr.bf16.mxu1 %v1371_v1 }
 0x3ab   : > { %1015 = vst [vmem:[#allocation3 + $0x90] sm:$0x3] %v1009_v60  ;;  %1016 = vst [vmem:[#allocation3 + $0x98] sm:$0x3] %v1010_v0  ;;  %v972_v2 = vpop.permute.xlu1 %971 }
 0x3ac   : > { %v975_v6 = vsel %vm457_vm5, %v1629_v17, %v972_v2  ;;  %1140 = vmatpush1.bf16.msra.mxu0 %v1103_v31  ;;  %v1102_v3 = vld [vmem:[#allocation3 + $0x58] sm:$0xff] }
 0x3ad   : > { %981 = vst [vmem:[#allocation3 + $0x88] sm:$0x3] %v975_v6  ;;  %v1040_v7 = vpop.permute.xlu0 %1039  ;;  %1179 = vmatpush1.bf16.msra.mxu1 %v1102_v3 }
 0x3ae   : > { %v1045_v8 = vsel %vm531_vm7, %v1038_v45, %v1040_v7  ;;  %v1046_v10 = vsel %vm531_vm7, %v1040_v7, %v1637_v23  ;;  %v1107_v11 = vld [vmem:[#allocation3 + $0x80] sm:$0xff]  ;;  %v1106_v4 = vld [vmem:[#allocation3 + $0x78] sm:$0xff]  ;;  %1180 = vmatprep.subr.bf16.mxu1 %v1371_v1 }
 0x3af   : > { %1051 = vst [vmem:[#allocation3 + $0xa8] sm:$0x3] %v1045_v8  ;;  %1052 = vst [vmem:[#allocation3 + $0xb0] sm:$0x3] %v1046_v10  ;;  %1141 = vmatprep.subr.bf16.mxu0 %v1107_v11  ;;  %v1008_v12 = vpop.permute.xlu1 %1007  ;;  %v1361_v10 = vld [vmem:[%s1464_s21] sm:$0xff] }
 0x3b0   : > { %v1011_v13 = vsel %vm494_vm6, %v1633_v19, %v1008_v12  ;;  %1142 = vmatpush1.bf16.msra.mxu0 %v1106_v4  ;;  %v1362_v12 = vld [vmem:[%s1464_s21 + $0x8] sm:$0xf] }
 0x3b1   : > { %1017 = vst [vmem:[#allocation3 + $0xa0] sm:$0x3] %v1011_v13  ;;  %v1076_v15 = vpop.permute.xlu0 %1075  ;;  %1181 = vmatpush1.bf16.msra.mxu1 %v1105_v14 }
 0x3b2   : > { %v1082_v16 = vsel %vm568_vm8, %v1076_v15, %v1078_v56  ;;  %v1110_v17 = vld [vmem:[#allocation3 + $0x98] sm:$0xff]  ;;  %v1109_v18 = vld [vmem:[#allocation3 + $0x90] sm:$0xff]  ;;  %1182 = vmatprep.subr.bf16.mxu1 %v1371_v1 }
 0x3b3   : > { %1088 = vst [vmem:[#allocation3 + $0xc8] sm:$0x3] %v1082_v16  ;;  %1143 = vmatprep.subr.bf16.mxu0 %v1110_v17  ;;  %v1044_v20 = vpop.permute.xlu1 %1043 }
 0x3b4   : > { %v1047_v21 = vsel %vm531_vm7, %v1637_v23, %v1044_v20  ;;  %1144 = vmatpush1.bf16.msra.mxu0 %v1109_v18  ;;  %v1108_v22 = vld [vmem:[#allocation3 + $0x88] sm:$0xff] }
 0x3b5   : > { %1053 = vst [vmem:[#allocation3 + $0xb8] sm:$0x3] %v1047_v21  ;;  %v1074_v19 = vpop.permute.xlu0 %1073  ;;  %1183 = vmatpush1.bf16.msra.mxu1 %v1108_v22 }
 0x3b6   : > { %v1081_v24 = vsel %vm568_vm8, %v1074_v19, %v1076_v15  ;;  %v1113_v25 = vld [vmem:[#allocation3 + $0xb0] sm:$0xff]  ;;  %v1112_v26 = vld [vmem:[#allocation3 + $0xa8] sm:$0xff]  ;;  %1184 = vmatprep.subr.bf16.mxu1 %v1371_v1 }
 0x3b7   : > { %1087 = vst [vmem:[#allocation3 + $0xc0] sm:$0x3] %v1081_v24  ;;  %1145 = vmatprep.subr.bf16.mxu0 %v1113_v25  ;;  %v1080_v27 = vpop.permute.xlu1 %1079 }
 0x3b8   : > { %v1083_v28 = vsel %vm568_vm8, %v1078_v56, %v1080_v27  ;;  %1146 = vmatpush1.bf16.msra.mxu0 %v1112_v26  ;;  %v1111_v29 = vld [vmem:[#allocation3 + $0xa0] sm:$0xff] }
 0x3b9   : > { %1089 = vst [vmem:[#allocation3 + $0xd0] sm:$0x3] %v1083_v28  ;;  %1185 = vmatpush1.bf16.msra.mxu1 %v1111_v29 }
 0x3ba   : > { %v1116_v23 = vld [vmem:[#allocation3 + $0xc8] sm:$0xff]  ;;  %1186 = vmatprep.subr.bf16.mxu1 %v1371_v1 }
 0x3bb   : > { %1147 = vmatprep.subr.bf16.mxu0 %v1116_v23 }
 0x3bc   : > { %v1114_v30 = vld [vmem:[#allocation3 + $0xb8] sm:$0xff] }
 0x3bd   : > { %1187 = vmatpush1.bf16.msra.mxu1 %v1114_v30 }
 0x3be   : > { %v1115_v32 = vld [vmem:[#allocation3 + $0xc0] sm:$0xff]  ;;  %1188 = vmatprep.subr.bf16.mxu1 %v1371_v1 }
 0x3bf   : > { %1148 = vmatpush1.bf16.msra.mxu0 %v1115_v32 }
 0x3c0   : > { %v1117_v33 = vld [vmem:[#allocation3 + $0xd0] sm:$0xff] }
 0x3c1   : > { %1189 = vmatpush1.bf16.msra.mxu1 %v1117_v33 }
 0x3c2   : > { %1164 = vmatmul.mubr.bf16.vlgmr.msra.gmra.mrb[4].mxu0 %v1620_v5 }
 0x3c4   : > { %1205 = vmatmul.mubr.bf16.vlgmr.msra.gmra.mrb[4].mxu1 %v1620_v5 }
 0x495   : > { %v1165_v34 = vpop.f32.mrb[4].mxu0 }
 0x496   : > { %v1212_v35 = vmul.f32 %v1165_v34, %v1563_v61  ;;  %v1167_v36 = vpop.f32.mrb[5].mxu0 }
 0x497   : > { %v1213_v37 = vmul.f32 %v1167_v36, %v1567_v63  ;;  %v1169_v38 = vpop.f32.mrb[6].mxu0  ;;  %v1206_v39 = vpop.f32.mrb[4].mxu1 }
 0x498   : > { %v1215_v40 = vsel %vm720_vm9, %v1212_v35, 0.0  ;;  %v1214_v41 = vmul.f32 %v1206_v39, %v1565_v62  ;;  %v1170_v1 = vpop.f32.mrb[7].mxu0  ;;  %v1208_v42 = vpop.f32.mrb[5].mxu1 }
 0x499   : > { %v1216_v43 = vsel %vm720_vm9, %v1213_v37, 0.0  ;;  %v1209_v44 = vpop.f32.mrb[6].mxu1 }
 0x49a   : > { %v1210_v45 = vpop.f32.mrb[7].mxu1  ;;  %v1217_v46 = vadd.f32 %v1216_v43, %v1215_v40  ;;  %v1218_v5 = vsel %vm720_vm9, %v1214_v41, 0.0 }
 0x49c   : > { %v1219_v47 = vadd.f32 %v1218_v5, %v1217_v46 }
 0x49e   : > { %1220 = vadd.xlane.f32.xlu0 %v1219_v47 }
 0x52b   : > { %v1221_v48 = vpop.xlane.xlu0 %1220 }
 0x52c   : > { %v1222_v49 = vmul.f32 0.00390625, %v1221_v48 }
 0x52e   : > { %v1223_v50 = vsub.f32 %v1165_v34, %v1222_v49  ;;  %v1224_v51 = vsub.f32 %v1167_v36, %v1222_v49  ;;  %v1225_v52 = vsub.f32 %v1206_v39, %v1222_v49 }
 0x530   : > { %v1226_v53 = vmul.f32 %v1223_v50, %v1563_v61  ;;  %v1227_v54 = vmul.f32 %v1224_v51, %v1567_v63  ;;  %v1228_v55 = vmul.f32 %v1225_v52, %v1565_v62 }
 0x532   : > { %v1229_v56 = vmul.f32 %v1226_v53, %v1226_v53  ;;  %v1230_v57 = vmul.f32 %v1227_v54, %v1227_v54  ;;  %v1231_v58 = vmul.f32 %v1228_v55, %v1228_v55 }
 0x534   : > { %v1232_v59 = vsel %vm720_vm9, %v1229_v56, 0.0  ;;  %v1233_v60 = vsel %vm720_vm9, %v1230_v57, 0.0  ;;  %v1235_v2 = vsel %vm720_vm9, %v1231_v58, 0.0 }
 0x535   : > { %v1234_v0 = vadd.f32 %v1233_v60, %v1232_v59 }
 0x537   : > { %v1236_v31 = vadd.f32 %v1235_v2, %v1234_v0 }
 0x539   : > { %1237 = vadd.xlane.f32.xlu1 %v1236_v31 }
 0x5c6   : > { %v1238_v61 = vpop.xlane.xlu1 %1237 }
 0x5c7   : > { %v1239_v6 = vmul.f32 0.00390625, %v1238_v61 }
 0x5c9   : > { %v1240_v63 = vadd.f32 1e-05, %v1239_v6 }
 0x5cb   : > { %1359 = vrsqrt.f32 %v1240_v63 }
 0x5d5   : > { %v1360_v62 = vpop.eup %1359 }
 0x5d6   : > { %v1242_v3 = vmul.f32 %v1360_v62, %v1226_v53  ;;  %v1243_v7 = vmul.f32 %v1360_v62, %v1227_v54  ;;  %v1244_v8 = vmul.f32 %v1360_v62, %v1228_v55 }
 0x5d8   : > { %v1245_v11 = vadd.f32 %v1361_v10, %v1242_v3  ;;  %v1246_v4 = vadd.f32 %v1243_v7, %v1471_v9  ;;  %v1247_v13 = vadd.f32 %v1362_v12, %v1244_v8 }
 0x5da   : > { %v1248_v14 = vmax.f32 %v1245_v11, 0.0  ;;  %v1249_v15 = vmax.f32 %v1246_v4, 0.0  ;;  %v1250_v16 = vmax.f32 %v1247_v13, 0.0 }
 0x5dc   : > { %v1253_v17 = vcombine.low %v1248_v14, %v1249_v15  ;;  %1256 = vst [vmem:[%s197_s12 + $0x8] sm:$0xf] %v1250_v16 }
 0x5de   : > { %1255 = vst [vmem:[%s197_s12] sm:$0xff] %v1253_v17 }
 0x5df PF: > { %s14_s15 = sadd.s32 1, %s1369_s15  }
 0x5e0   : > { %p11_p4 = scmp.ge.s32.totalorder %s14_s15, 4  }
 0x5e2   :  { %13 = sbr.rel (!%p11_p4) target bundleno = 1 (0x1), region = 66 }

</bundles_post_ra>
